<compile_context>
chip_gen: v5e
topology: v5e:2x2
jax: 0.10.0
libtpu: 0.0.40
codegen_flags: <defaults>
</compile_context>

<pallas_src>
import jax
import jax.numpy as jnp
from jax.experimental import pallas as pl
from jax.experimental.pallas import tpu as pltpu


def _fc_weighted_agg_kernel(x_ref, w1_ref, b1_ref, wfc_ref, wch_ref, bch_ref,
                            out_ref):
    """One batch block.

    x_ref   : (C, b_blk, H) bf16  channel-major activations (streamed)
    w1_ref  : (H, H)        bf16  fc_filter_1 weight, (in, out) layout (resident)
    b1_ref  : (1, H)        f32   fc_filter_1 bias (resident)
    wfc_ref : (1, H)        f32   attention fc weight row (resident)
    wch_ref : (C, C)        f32   fc_channel_1 weight  (SMEM scalars)
    bch_ref : (C,)          f32   fc_channel_1 bias    (SMEM scalars)
    out_ref : (b_blk, H)          aggregated context
    """
    C = x_ref.shape[0]
    w1 = w1_ref[...]                     # bf16
    b1 = b1_ref[...]                     # f32
    wfc = wfc_ref[...]                   # f32

    # (1) hidden Linear + ReLU: C MXU matmuls, bf16 operands / f32 accumulate.
    h1 = []
    for c in range(C):
        acc = jnp.dot(x_ref[c], w1, preferred_element_type=jnp.float32)
        h1.append(jnp.maximum(acc + b1, 0.0))                       # (b_blk, H) f32

    # (2) channel Linear + ReLU as C^2 scalar-broadcast MACs on the VPU
    #     (replaces permute -> Linear(C,C) -> permute; no block-diag matmul).
    # (3) attention logits: VPU multiply + XLU lane reduce (no N=1 matmul);
    #     the fc bias is omitted — a constant shift cancels in the softmax.
    h2 = []
    logits = []
    for co in range(C):
        mix = wch_ref[co, 0] * h1[0]
        for ci in range(1, C):
            mix = mix + wch_ref[co, ci] * h1[ci]
        h2_c = jnp.maximum(mix + bch_ref[co], 0.0)                  # (b_blk, H) f32
        h2.append(h2_c)
        logits.append(jnp.sum(h2_c * wfc, axis=1, keepdims=True))   # (b_blk, 1)

    # (4) per-sample softmax over the C channels (per-sample stabilizer).
    m = logits[0]
    for c in range(1, C):
        m = jnp.maximum(m, logits[c])
    l = None
    ctx = None
    for c in range(C):
        e = jnp.exp(logits[c] - m)                                  # (b_blk, 1) EUP
        l = e if l is None else l + e
        w_h2 = e * h2[c]
        ctx = w_h2 if ctx is None else ctx + w_h2                   # (b_blk, H)

    # (5) flash-style normalization: one reciprocal per sample row.
    out_ref[...] = (ctx * pl.reciprocal(l, approx=False)).astype(out_ref.dtype)


def _pick_batch_block(B, C, H):
    """Batch block: big enough to amortize the ~0.35 us/step grid overhead,
    small enough that double-buffered tiles + f32 intermediates stay well
    inside v7x's 64 MiB VMEM, and (when B allows) leaving >= 2 grid steps so
    v7x's second TensorCore gets work."""
    hp = ((H + 127) // 128) * 128                        # lane-padded width in VMEM
    per_row = (2 * C + 8) * hp * 4 + 2 * C * hp * 2      # f32 intermediates + 2x bf16 x
    blk = max(8, (36 * 1024 * 1024) // per_row)          # ~36 MiB working-set budget
    blk = min(blk, 2048)
    half = (B + 1) // 2
    if half < blk:                                       # keep >= 2 grid steps
        blk = half
    return max(8, (blk // 8) * 8)                        # sublane multiple of 8


def fc_weighted_aggregation(x, w_filter, b_filter, w_channel, b_channel,
                            w_fc, b_fc=None, *, batch_block=None):
    """x: (B, C, H). Torch-layout params: w_filter (H, H), b_filter (H,),
    w_channel (C, C), b_channel (C,), w_fc (1, H), b_fc (1,). Returns (B, H)."""
    del b_fc  # constant logit shift cancels exactly in the softmax
    B, C, H = x.shape
    out_dtype = x.dtype

    b_blk = batch_block if batch_block is not None else _pick_batch_block(B, C, H)
    n_blocks = -(-B // b_blk)
    Bp = n_blocks * b_blk

    # Channel-major bf16 activations: one fused XLA transpose+cast pass; gives
    # the kernel contiguous (b_blk, H) per-channel slabs and halves x HBM reads.
    xc = jnp.transpose(x, (1, 0, 2)).astype(jnp.bfloat16)           # (C, B, H)
    if Bp != B:
        xc = jnp.pad(xc, ((0, 0), (0, Bp - B), (0, 0)))             # benign rows

    # Tiny parameter preprocessing (the kron/seg builds are gone).
    f32 = jnp.float32
    w1 = w_filter.T.astype(jnp.bfloat16)                            # (H, H) in->out
    b1 = b_filter.reshape(1, H).astype(f32)                         # (1, H)
    wfc = w_fc.reshape(1, H).astype(f32)                            # (1, H)
    wch = w_channel.astype(f32)                                     # (C, C) -> SMEM
    bch = b_channel.astype(f32)                                     # (C,)   -> SMEM

    # VMEM budget estimate (lane-padded), clamped to <= 48 MiB so it is safe on
    # v7x (64 MiB physical) while still generous on v5e/v6e (128 MiB).
    hp = ((H + 127) // 128) * 128
    need = (2 * C * b_blk * hp * 2                                  # x tile x2 (bf16)
            + 2 * b_blk * hp * jnp.dtype(out_dtype).itemsize        # out tile x2
            + (2 * C + 8) * b_blk * hp * 4                          # f32 intermediates
            + 2 * 1024 * 1024)                                      # weights + slack
    vmem_limit = int(min(max(need, 32 * 1024 * 1024), 48 * 1024 * 1024))

    const2 = lambda i: (0, 0)

    out = pl.pallas_call(
        _fc_weighted_agg_kernel,
        out_shape=jax.ShapeDtypeStruct((Bp, H), out_dtype),
        grid=(n_blocks,),
        in_specs=[
            pl.BlockSpec((C, b_blk, H), lambda i: (0, i, 0)),       # x: streamed
            pl.BlockSpec((H, H), const2),                           # w1: resident
            pl.BlockSpec((1, H), const2),                           # b1: resident
            pl.BlockSpec((1, H), const2),                           # wfc: resident
            pl.BlockSpec(memory_space=pltpu.MemorySpace.SMEM),      # w_channel scalars
            pl.BlockSpec(memory_space=pltpu.MemorySpace.SMEM),      # b_channel scalars
        ],
        out_specs=pl.BlockSpec((b_blk, H), lambda i: (i, 0)),       # no H pad / slice
        compiler_params=pltpu.CompilerParams(
            dimension_semantics=("parallel",),                      # megacore / dual-TC
            vmem_limit_bytes=vmem_limit,
        ),
    )(xc, w1, b1, wfc, wch, bch)

    return out if Bp == B else out[:B]


def _reference(x, w_filter, b_filter, w_channel, b_channel, w_fc, b_fc,
               *, mxu_dtype=None):
    """Pure-JAX transcription of the PyTorch module (including b_fc).
    mxu_dtype=bfloat16 mimics the kernel's bf16-operand / f32-accumulate matmul."""
    xm = x if mxu_dtype is None else x.astype(mxu_dtype)
    wm = w_filter if mxu_dtype is None else w_filter.astype(mxu_dtype)
    h = jax.nn.relu(jnp.einsum("bch,oh->bco", xm, wm,
                               preferred_element_type=jnp.float32) + b_filter)
    ht = jnp.transpose(h, (0, 2, 1))                                         # (B, H, C)
    ht = jax.nn.relu(jnp.einsum("bhc,oc->bho", ht, w_channel) + b_channel)   # (B, H, C)
    h2 = jnp.transpose(ht, (0, 2, 1))                                        # (B, C, H)
    s = jnp.einsum("bch,oh->bco", h2, w_fc)[..., 0] + b_fc                   # (B, C)
    w = jax.nn.softmax(s, axis=1)[..., None]                                 # (B, C, 1)
    return jnp.sum(w * h2, axis=1)                                           # (B, H)


if __name__ == "__main__":
    B, C, H = 2, 4, 32   # batch, sensor_channel, hidden_dim

    key = jax.random.PRNGKey(0)
    kx, k1, k2, k3, k4, k5, k6 = jax.random.split(key, 7)

    x = jax.random.normal(kx, (B, C, H), dtype=jnp.float32)

    # torch Linear default init scale: U(-1/sqrt(fan_in), 1/sqrt(fan_in))
    bh = 1.0 / (H ** 0.5)
    bc = 1.0 / (C ** 0.5)
    w_filter = jax.random.uniform(k1, (H, H), jnp.float32, -bh, bh)    # (out, in)
    b_filter = jax.random.uniform(k2, (H,), jnp.float32, -bh, bh)
    w_channel = jax.random.uniform(k3, (C, C), jnp.float32, -bc, bc)   # (out, in)
    b_channel = jax.random.uniform(k4, (C,), jnp.float32, -bc, bc)
    w_fc = jax.random.uniform(k5, (1, H), jnp.float32, -bh, bh)        # (out, in)
    b_fc = jax.random.uniform(k6, (1,), jnp.float32, -bh, bh)

    out = jax.jit(fc_weighted_aggregation)(x, w_filter, b_filter, w_channel,
                                           b_channel, w_fc, b_fc)
    out = jax.block_until_ready(out)
    assert out.shape == (B, H), f"bad output shape {out.shape}"

    # Tight check vs a reference that uses the same bf16-operand MXU math.
    ref_bf16 = _reference(x, w_filter, b_filter, w_channel, b_channel,
                          w_fc, b_fc, mxu_dtype=jnp.bfloat16)
    assert jnp.allclose(out, ref_bf16, atol=2e-3, rtol=2e-3), "mismatch vs bf16 reference"

    # Loose check vs the exact f32 PyTorch-equivalent reference.
    ref_f32 = _reference(x, w_filter, b_filter, w_channel, b_channel, w_fc, b_fc)
    assert jnp.allclose(out, ref_f32, atol=5e-2, rtol=5e-2), "mismatch vs f32 reference"

    print("KERNEL_OK")
</pallas_src>

<mosaic_0001>
module attributes {stable_mosaic.version = 11 : i64} {
  func.func @_fc_weighted_agg_kernel(%arg0: i32, %arg1: memref<4x8x32xbf16, #tpu.memory_space<vmem>>, %arg2: memref<32x32xbf16, #tpu.memory_space<vmem>>, %arg3: memref<1x32xf32, #tpu.memory_space<vmem>>, %arg4: memref<1x32xf32, #tpu.memory_space<vmem>>, %arg5: memref<4x4xf32, #tpu.memory_space<smem>>, %arg6: memref<4xf32, #tpu.memory_space<smem>>, %arg7: memref<8x32xf32, #tpu.memory_space<vmem>>) attributes {dimension_semantics = [#tpu.dimension_semantics<parallel>], iteration_bounds = array<i64: 1>, scalar_prefetch = 0 : i64, scratch_operands = 0 : i64, tpu.core_type = #tpu.core_type<tc>, window_params = [{transform_indices = @transform_0, window_bounds = array<i64: 4, 8, 32>}, {pipeline_mode = #tpu.pipeline_mode<synchronous>, transform_indices = @transform_1, window_bounds = array<i64: 32, 32>}, {pipeline_mode = #tpu.pipeline_mode<synchronous>, transform_indices = @transform_2, window_bounds = array<i64: 1, 32>}, {pipeline_mode = #tpu.pipeline_mode<synchronous>, transform_indices = @transform_3, window_bounds = array<i64: 1, 32>}, {transform_indices = @transform_4, window_bounds = array<i64: 4, 4>}, {transform_indices = @transform_5, window_bounds = array<i64: 4>}, {transform_indices = @transform_6, window_bounds = array<i64: 8, 32>}]} {
    %c0 = arith.constant 0 : index
    %c0_0 = arith.constant 0 : index
    %0 = vector.load %arg2[%c0, %c0_0] : memref<32x32xbf16, #tpu.memory_space<vmem>>, vector<32x32xbf16>
    %c0_1 = arith.constant 0 : index
    %c0_2 = arith.constant 0 : index
    %1 = vector.load %arg3[%c0_1, %c0_2] : memref<1x32xf32, #tpu.memory_space<vmem>>, vector<1x32xf32>
    %c0_3 = arith.constant 0 : index
    %c0_4 = arith.constant 0 : index
    %2 = vector.load %arg4[%c0_3, %c0_4] : memref<1x32xf32, #tpu.memory_space<vmem>>, vector<1x32xf32>
    %c0_5 = arith.constant 0 : index
    %c0_6 = arith.constant 0 : index
    %c0_7 = arith.constant 0 : index
    %3 = vector.load %arg1[%c0_5, %c0_6, %c0_7] : memref<4x8x32xbf16, #tpu.memory_space<vmem>>, vector<1x8x32xbf16>
    %4 = vector.shape_cast %3 : vector<1x8x32xbf16> to vector<8x32xbf16>
    %cst = arith.constant dense<0.000000e+00> : vector<8x32xf32>
    %5 = tpu.matmul %4, %0, %cst {dimension_numbers = #tpu.dot_dimension_numbers<[1], [0], [0], [1], [0, 0, 1, 1], [], []>} : vector<8x32xbf16>, vector<32x32xbf16>, vector<8x32xf32> -> vector<8x32xf32>
    %6 = vector.broadcast %1 : vector<1x32xf32> to vector<8x32xf32>
    %7 = arith.addf %5, %6 : vector<8x32xf32>
    %cst_8 = arith.constant 0.000000e+00 : f32
    %8 = vector.broadcast %cst_8 : f32 to vector<8x32xf32>
    %9 = arith.maximumf %7, %8 : vector<8x32xf32>
    %c1 = arith.constant 1 : index
    %c0_9 = arith.constant 0 : index
    %c0_10 = arith.constant 0 : index
    %10 = vector.load %arg1[%c1, %c0_9, %c0_10] : memref<4x8x32xbf16, #tpu.memory_space<vmem>>, vector<1x8x32xbf16>
    %11 = vector.shape_cast %10 : vector<1x8x32xbf16> to vector<8x32xbf16>
    %cst_11 = arith.constant dense<0.000000e+00> : vector<8x32xf32>
    %12 = tpu.matmul %11, %0, %cst_11 {dimension_numbers = #tpu.dot_dimension_numbers<[1], [0], [0], [1], [0, 0, 1, 1], [], []>} : vector<8x32xbf16>, vector<32x32xbf16>, vector<8x32xf32> -> vector<8x32xf32>
    %13 = vector.broadcast %1 : vector<1x32xf32> to vector<8x32xf32>
    %14 = arith.addf %12, %13 : vector<8x32xf32>
    %cst_12 = arith.constant 0.000000e+00 : f32
    %15 = vector.broadcast %cst_12 : f32 to vector<8x32xf32>
    %16 = arith.maximumf %14, %15 : vector<8x32xf32>
    %c2 = arith.constant 2 : index
    %c0_13 = arith.constant 0 : index
    %c0_14 = arith.constant 0 : index
    %17 = vector.load %arg1[%c2, %c0_13, %c0_14] : memref<4x8x32xbf16, #tpu.memory_space<vmem>>, vector<1x8x32xbf16>
    %18 = vector.shape_cast %17 : vector<1x8x32xbf16> to vector<8x32xbf16>
    %cst_15 = arith.constant dense<0.000000e+00> : vector<8x32xf32>
    %19 = tpu.matmul %18, %0, %cst_15 {dimension_numbers = #tpu.dot_dimension_numbers<[1], [0], [0], [1], [0, 0, 1, 1], [], []>} : vector<8x32xbf16>, vector<32x32xbf16>, vector<8x32xf32> -> vector<8x32xf32>
    %20 = vector.broadcast %1 : vector<1x32xf32> to vector<8x32xf32>
    %21 = arith.addf %19, %20 : vector<8x32xf32>
    %cst_16 = arith.constant 0.000000e+00 : f32
    %22 = vector.broadcast %cst_16 : f32 to vector<8x32xf32>
    %23 = arith.maximumf %21, %22 : vector<8x32xf32>
    %c3 = arith.constant 3 : index
    %c0_17 = arith.constant 0 : index
    %c0_18 = arith.constant 0 : index
    %24 = vector.load %arg1[%c3, %c0_17, %c0_18] : memref<4x8x32xbf16, #tpu.memory_space<vmem>>, vector<1x8x32xbf16>
    %25 = vector.shape_cast %24 : vector<1x8x32xbf16> to vector<8x32xbf16>
    %cst_19 = arith.constant dense<0.000000e+00> : vector<8x32xf32>
    %26 = tpu.matmul %25, %0, %cst_19 {dimension_numbers = #tpu.dot_dimension_numbers<[1], [0], [0], [1], [0, 0, 1, 1], [], []>} : vector<8x32xbf16>, vector<32x32xbf16>, vector<8x32xf32> -> vector<8x32xf32>
    %27 = vector.broadcast %1 : vector<1x32xf32> to vector<8x32xf32>
    %28 = arith.addf %26, %27 : vector<8x32xf32>
    %cst_20 = arith.constant 0.000000e+00 : f32
    %29 = vector.broadcast %cst_20 : f32 to vector<8x32xf32>
    %30 = arith.maximumf %28, %29 : vector<8x32xf32>
    %c0_21 = arith.constant 0 : index
    %c0_22 = arith.constant 0 : index
    %31 = memref.load %arg5[%c0_21, %c0_22] : memref<4x4xf32, #tpu.memory_space<smem>>
    %32 = vector.broadcast %31 : f32 to vector<8x32xf32>
    %33 = arith.mulf %32, %9 : vector<8x32xf32>
    %c0_23 = arith.constant 0 : index
    %c1_24 = arith.constant 1 : index
    %34 = memref.load %arg5[%c0_23, %c1_24] : memref<4x4xf32, #tpu.memory_space<smem>>
    %35 = vector.broadcast %34 : f32 to vector<8x32xf32>
    %36 = arith.mulf %35, %16 : vector<8x32xf32>
    %37 = arith.addf %33, %36 : vector<8x32xf32>
    %c0_25 = arith.constant 0 : index
    %c2_26 = arith.constant 2 : index
    %38 = memref.load %arg5[%c0_25, %c2_26] : memref<4x4xf32, #tpu.memory_space<smem>>
    %39 = vector.broadcast %38 : f32 to vector<8x32xf32>
    %40 = arith.mulf %39, %23 : vector<8x32xf32>
    %41 = arith.addf %37, %40 : vector<8x32xf32>
    %c0_27 = arith.constant 0 : index
    %c3_28 = arith.constant 3 : index
    %42 = memref.load %arg5[%c0_27, %c3_28] : memref<4x4xf32, #tpu.memory_space<smem>>
    %43 = vector.broadcast %42 : f32 to vector<8x32xf32>
    %44 = arith.mulf %43, %30 : vector<8x32xf32>
    %45 = arith.addf %41, %44 : vector<8x32xf32>
    %c0_29 = arith.constant 0 : index
    %46 = memref.load %arg6[%c0_29] : memref<4xf32, #tpu.memory_space<smem>>
    %47 = vector.broadcast %46 : f32 to vector<8x32xf32>
    %48 = arith.addf %45, %47 : vector<8x32xf32>
    %cst_30 = arith.constant 0.000000e+00 : f32
    %49 = vector.broadcast %cst_30 : f32 to vector<8x32xf32>
    %50 = arith.maximumf %48, %49 : vector<8x32xf32>
    %51 = vector.broadcast %2 : vector<1x32xf32> to vector<8x32xf32>
    %52 = arith.mulf %50, %51 : vector<8x32xf32>
    %cst_31 = arith.constant dense<0.000000e+00> : vector<8xf32>
    %53 = vector.multi_reduction <add>, %52, %cst_31 [1] : vector<8x32xf32> to vector<8xf32>
    %54 = vector.shape_cast %53 : vector<8xf32> to vector<8x1xf32>
    %c1_32 = arith.constant 1 : index
    %c0_33 = arith.constant 0 : index
    %55 = memref.load %arg5[%c1_32, %c0_33] : memref<4x4xf32, #tpu.memory_space<smem>>
    %56 = vector.broadcast %55 : f32 to vector<8x32xf32>
    %57 = arith.mulf %56, %9 : vector<8x32xf32>
    %c1_34 = arith.constant 1 : index
    %c1_35 = arith.constant 1 : index
    %58 = memref.load %arg5[%c1_34, %c1_35] : memref<4x4xf32, #tpu.memory_space<smem>>
    %59 = vector.broadcast %58 : f32 to vector<8x32xf32>
    %60 = arith.mulf %59, %16 : vector<8x32xf32>
    %61 = arith.addf %57, %60 : vector<8x32xf32>
    %c1_36 = arith.constant 1 : index
    %c2_37 = arith.constant 2 : index
    %62 = memref.load %arg5[%c1_36, %c2_37] : memref<4x4xf32, #tpu.memory_space<smem>>
    %63 = vector.broadcast %62 : f32 to vector<8x32xf32>
    %64 = arith.mulf %63, %23 : vector<8x32xf32>
    %65 = arith.addf %61, %64 : vector<8x32xf32>
    %c1_38 = arith.constant 1 : index
    %c3_39 = arith.constant 3 : index
    %66 = memref.load %arg5[%c1_38, %c3_39] : memref<4x4xf32, #tpu.memory_space<smem>>
    %67 = vector.broadcast %66 : f32 to vector<8x32xf32>
    %68 = arith.mulf %67, %30 : vector<8x32xf32>
    %69 = arith.addf %65, %68 : vector<8x32xf32>
    %c1_40 = arith.constant 1 : index
    %70 = memref.load %arg6[%c1_40] : memref<4xf32, #tpu.memory_space<smem>>
    %71 = vector.broadcast %70 : f32 to vector<8x32xf32>
    %72 = arith.addf %69, %71 : vector<8x32xf32>
    %cst_41 = arith.constant 0.000000e+00 : f32
    %73 = vector.broadcast %cst_41 : f32 to vector<8x32xf32>
    %74 = arith.maximumf %72, %73 : vector<8x32xf32>
    %75 = vector.broadcast %2 : vector<1x32xf32> to vector<8x32xf32>
    %76 = arith.mulf %74, %75 : vector<8x32xf32>
    %cst_42 = arith.constant dense<0.000000e+00> : vector<8xf32>
    %77 = vector.multi_reduction <add>, %76, %cst_42 [1] : vector<8x32xf32> to vector<8xf32>
    %78 = vector.shape_cast %77 : vector<8xf32> to vector<8x1xf32>
    %c2_43 = arith.constant 2 : index
    %c0_44 = arith.constant 0 : index
    %79 = memref.load %arg5[%c2_43, %c0_44] : memref<4x4xf32, #tpu.memory_space<smem>>
    %80 = vector.broadcast %79 : f32 to vector<8x32xf32>
    %81 = arith.mulf %80, %9 : vector<8x32xf32>
    %c2_45 = arith.constant 2 : index
    %c1_46 = arith.constant 1 : index
    %82 = memref.load %arg5[%c2_45, %c1_46] : memref<4x4xf32, #tpu.memory_space<smem>>
    %83 = vector.broadcast %82 : f32 to vector<8x32xf32>
    %84 = arith.mulf %83, %16 : vector<8x32xf32>
    %85 = arith.addf %81, %84 : vector<8x32xf32>
    %c2_47 = arith.constant 2 : index
    %c2_48 = arith.constant 2 : index
    %86 = memref.load %arg5[%c2_47, %c2_48] : memref<4x4xf32, #tpu.memory_space<smem>>
    %87 = vector.broadcast %86 : f32 to vector<8x32xf32>
    %88 = arith.mulf %87, %23 : vector<8x32xf32>
    %89 = arith.addf %85, %88 : vector<8x32xf32>
    %c2_49 = arith.constant 2 : index
    %c3_50 = arith.constant 3 : index
    %90 = memref.load %arg5[%c2_49, %c3_50] : memref<4x4xf32, #tpu.memory_space<smem>>
    %91 = vector.broadcast %90 : f32 to vector<8x32xf32>
    %92 = arith.mulf %91, %30 : vector<8x32xf32>
    %93 = arith.addf %89, %92 : vector<8x32xf32>
    %c2_51 = arith.constant 2 : index
    %94 = memref.load %arg6[%c2_51] : memref<4xf32, #tpu.memory_space<smem>>
    %95 = vector.broadcast %94 : f32 to vector<8x32xf32>
    %96 = arith.addf %93, %95 : vector<8x32xf32>
    %cst_52 = arith.constant 0.000000e+00 : f32
    %97 = vector.broadcast %cst_52 : f32 to vector<8x32xf32>
    %98 = arith.maximumf %96, %97 : vector<8x32xf32>
    %99 = vector.broadcast %2 : vector<1x32xf32> to vector<8x32xf32>
    %100 = arith.mulf %98, %99 : vector<8x32xf32>
    %cst_53 = arith.constant dense<0.000000e+00> : vector<8xf32>
    %101 = vector.multi_reduction <add>, %100, %cst_53 [1] : vector<8x32xf32> to vector<8xf32>
    %102 = vector.shape_cast %101 : vector<8xf32> to vector<8x1xf32>
    %c3_54 = arith.constant 3 : index
    %c0_55 = arith.constant 0 : index
    %103 = memref.load %arg5[%c3_54, %c0_55] : memref<4x4xf32, #tpu.memory_space<smem>>
    %104 = vector.broadcast %103 : f32 to vector<8x32xf32>
    %105 = arith.mulf %104, %9 : vector<8x32xf32>
    %c3_56 = arith.constant 3 : index
    %c1_57 = arith.constant 1 : index
    %106 = memref.load %arg5[%c3_56, %c1_57] : memref<4x4xf32, #tpu.memory_space<smem>>
    %107 = vector.broadcast %106 : f32 to vector<8x32xf32>
    %108 = arith.mulf %107, %16 : vector<8x32xf32>
    %109 = arith.addf %105, %108 : vector<8x32xf32>
    %c3_58 = arith.constant 3 : index
    %c2_59 = arith.constant 2 : index
    %110 = memref.load %arg5[%c3_58, %c2_59] : memref<4x4xf32, #tpu.memory_space<smem>>
    %111 = vector.broadcast %110 : f32 to vector<8x32xf32>
    %112 = arith.mulf %111, %23 : vector<8x32xf32>
    %113 = arith.addf %109, %112 : vector<8x32xf32>
    %c3_60 = arith.constant 3 : index
    %c3_61 = arith.constant 3 : index
    %114 = memref.load %arg5[%c3_60, %c3_61] : memref<4x4xf32, #tpu.memory_space<smem>>
    %115 = vector.broadcast %114 : f32 to vector<8x32xf32>
    %116 = arith.mulf %115, %30 : vector<8x32xf32>
    %117 = arith.addf %113, %116 : vector<8x32xf32>
    %c3_62 = arith.constant 3 : index
    %118 = memref.load %arg6[%c3_62] : memref<4xf32, #tpu.memory_space<smem>>
    %119 = vector.broadcast %118 : f32 to vector<8x32xf32>
    %120 = arith.addf %117, %119 : vector<8x32xf32>
    %cst_63 = arith.constant 0.000000e+00 : f32
    %121 = vector.broadcast %cst_63 : f32 to vector<8x32xf32>
    %122 = arith.maximumf %120, %121 : vector<8x32xf32>
    %123 = vector.broadcast %2 : vector<1x32xf32> to vector<8x32xf32>
    %124 = arith.mulf %122, %123 : vector<8x32xf32>
    %cst_64 = arith.constant dense<0.000000e+00> : vector<8xf32>
    %125 = vector.multi_reduction <add>, %124, %cst_64 [1] : vector<8x32xf32> to vector<8xf32>
    %126 = vector.shape_cast %125 : vector<8xf32> to vector<8x1xf32>
    %127 = arith.maximumf %54, %78 : vector<8x1xf32>
    %128 = arith.maximumf %127, %102 : vector<8x1xf32>
    %129 = arith.maximumf %128, %126 : vector<8x1xf32>
    %130 = arith.subf %54, %129 : vector<8x1xf32>
    %131 = math.exp %130 : vector<8x1xf32>
    %132 = vector.broadcast %131 : vector<8x1xf32> to vector<8x32xf32>
    %133 = arith.mulf %132, %50 : vector<8x32xf32>
    %134 = arith.subf %78, %129 : vector<8x1xf32>
    %135 = math.exp %134 : vector<8x1xf32>
    %136 = arith.addf %131, %135 : vector<8x1xf32>
    %137 = vector.broadcast %135 : vector<8x1xf32> to vector<8x32xf32>
    %138 = arith.mulf %137, %74 : vector<8x32xf32>
    %139 = arith.addf %133, %138 : vector<8x32xf32>
    %140 = arith.subf %102, %129 : vector<8x1xf32>
    %141 = math.exp %140 : vector<8x1xf32>
    %142 = arith.addf %136, %141 : vector<8x1xf32>
    %143 = vector.broadcast %141 : vector<8x1xf32> to vector<8x32xf32>
    %144 = arith.mulf %143, %98 : vector<8x32xf32>
    %145 = arith.addf %139, %144 : vector<8x32xf32>
    %146 = arith.subf %126, %129 : vector<8x1xf32>
    %147 = math.exp %146 : vector<8x1xf32>
    %148 = arith.addf %142, %147 : vector<8x1xf32>
    %149 = vector.broadcast %147 : vector<8x1xf32> to vector<8x32xf32>
    %150 = arith.mulf %149, %122 : vector<8x32xf32>
    %151 = arith.addf %145, %150 : vector<8x32xf32>
    %152 = tpu.reciprocal %148 : vector<8x1xf32> -> vector<8x1xf32>
    %153 = vector.broadcast %152 : vector<8x1xf32> to vector<8x32xf32>
    %154 = arith.mulf %151, %153 : vector<8x32xf32>
    %c0_65 = arith.constant 0 : index
    %c0_66 = arith.constant 0 : index
    %155 = vector.load %arg7[%c0_65, %c0_66] : memref<8x32xf32, #tpu.memory_space<vmem>>, vector<8x32xf32>
    tpu.vector_store %arg7[%c0_65, %c0_66], %154 {strides = array<i32>} : memref<8x32xf32, #tpu.memory_space<vmem>>, vector<8x32xf32>,
    return
  }
  func.func @transform_0(%arg0: i32) -> (i32, i32, i32) {
    %c0_i32 = arith.constant 0 : i32
    %c0_i32_0 = arith.constant 0 : i32
    %c0_i32_1 = arith.constant 0 : i32
    return %c0_i32, %arg0, %c0_i32_0 : i32, i32, i32
  }
  func.func @transform_1(%arg0: i32) -> (i32, i32) {
    %c0_i32 = arith.constant 0 : i32
    %c0_i32_0 = arith.constant 0 : i32
    %c0_i32_1 = arith.constant 0 : i32
    return %c0_i32, %c0_i32_0 : i32, i32
  }
  func.func @transform_2(%arg0: i32) -> (i32, i32) {
    %c0_i32 = arith.constant 0 : i32
    %c0_i32_0 = arith.constant 0 : i32
    %c0_i32_1 = arith.constant 0 : i32
    return %c0_i32, %c0_i32_0 : i32, i32
  }
  func.func @transform_3(%arg0: i32) -> (i32, i32) {
    %c0_i32 = arith.constant 0 : i32
    %c0_i32_0 = arith.constant 0 : i32
    %c0_i32_1 = arith.constant 0 : i32
    return %c0_i32, %c0_i32_0 : i32, i32
  }
  func.func @transform_4(%arg0: i32) -> (i32, i32) {
    %c0_i32 = arith.constant 0 : i32
    %c0_i32_0 = arith.constant 0 : i32
    %c0_i32_1 = arith.constant 0 : i32
    return %c0_i32, %c0_i32_0 : i32, i32
  }
  func.func @transform_5(%arg0: i32) -> i32 {
    %c0_i32 = arith.constant 0 : i32
    %c0_i32_0 = arith.constant 0 : i32
    return %c0_i32 : i32
  }
  func.func @transform_6(%arg0: i32) -> (i32, i32) {
    %c0_i32 = arith.constant 0 : i32
    %c0_i32_0 = arith.constant 0 : i32
    return %arg0, %c0_i32 : i32, i32
  }
}

</mosaic_0001>

<bundles_post_ra>
// kernel: fc_weighted_aggregation.1
= control target key start
LH: loop header
LB: loop body
LE: loop exit
PB: predicated region body
PF: predicated region fallthrough
CT: control target
= control target key end

     0   :  { %11 = vsyncpa [#allocation3], 0  ;;  %s504_s0 = inlined_call_operand.vmem [shape: bf16[4,8,32], index: 0, kind: input, shape index: {}]   ;;  %s505_s1 = inlined_call_operand.vmem [shape: bf16[32,32], index: 1, kind: input, shape index: {}]   ;;  %s506_s2 = inlined_call_operand.vmem [shape: f32[1,32], index: 2, kind: input, shape index: {}]   ;;  %s507_s3 = inlined_call_operand.vmem [shape: f32[1,32], index: 3, kind: input, shape index: {}]   ;;  %s508_s4 = inlined_call_operand.vmem [shape: f32[4,4], index: 4, kind: input, shape index: {}]   ;;  %s509_s5 = inlined_call_operand.vmem [shape: f32[4], index: 5, kind: input, shape index: {}]   ;;  %s510_s6 = inlined_call_operand.vmem [shape: f32[8,32], index: 6, kind: output, shape index: {}]  }
   0x1   :  { %s26_s23 = sshll.u32 %s508_s4, 4  ;;  %s27_s23 = int_to_ptr.vmem [resolvable:$true] %s26_s23 }
   0x2   :  { %12 = vsyncpa [#allocation5], 0  ;;  %s35_s26 = sshll.u32 %s509_s5, 4  ;;  %s365_s27 = smov [#allocation2]   ;;  %s36_s26 = int_to_ptr.vmem [resolvable:$true] %s35_s26 }
   0x3   :  { %29 = dma.vmem_to_smem %s27_s23, 64, %s365_s27, [#allocation3]  }
   0x4   :  { %s366_s28 = smov [#allocation4]  }
   0x5   :  { %38 = dma.vmem_to_smem %s36_s26, 16, %s366_s28, [#allocation5]  }
   0x6   :  { %361 = dma.done.wait [#allocation3], 64  }
   0x7   :  { %362 = vsyncadd [#allocation3], 4294967232 }
   0x8   :  { %363 = dma.done.wait [#allocation5], 16  }
   0x9   :  { %364 = vsyncadd [#allocation5], 4294967280 }
   0xa   :  { %47 = sfence }
   0xb   :  { %v322_v0 = vld [vmem:[%s505_s1 + $0x8] sm:$0xff]  ;;  %v321_v1 = vld [vmem:[%s505_s1] sm:$0xff]  ;;  %vm71_vm0 = vcmask 261120   ;;  %s430_s14 = sld [smem:[#allocation2]] }
   0xc   :  { %81 = vmatpush.bf16.msra.mxu0 %v322_v0  ;;  %100 = vmatpush.bf16.msra.mxu1 %v322_v0  ;;  %v55_v2 = vld [vmem:[%s504_s0] sm:$0xf]  ;;  %v297_v3 = vld [vmem:[%s504_s0 + $0x4] sm:$0xf]  ;;  %v299_v4 = vld [vmem:[%s504_s0 + $0x8] sm:$0xf] }
   0xd   :  { %119 = vmatpush.bf16.msra.mxu2 %v322_v0  ;;  %138 = vmatpush.bf16.msra.mxu3 %v322_v0  ;;  %v301_v5 = vld [vmem:[%s504_s0 + $0xc] sm:$0xf]  ;;  %s432_s15 = sld [smem:[#allocation2 + $0x80]]  ;;  %v325_v6 = vld [vmem:[%s506_s2] ss:$0 sm:$0xff] }
   0xe   :  { %s434_s16 = sld [smem:[#allocation2 + $0x100]] }
   0xf   :  { %s436_s17 = sld [smem:[#allocation2 + $0x180]] }
  0x10   :  { %82 = vmatpush.bf16.msra.mxu0 %v321_v1  ;;  %101 = vmatpush.bf16.msra.mxu1 %v321_v1  ;;  %s438_s18 = sld [smem:[#allocation2 + $0x1]] }
  0x11   :  { %120 = vmatpush.bf16.msra.mxu2 %v321_v1  ;;  %139 = vmatpush.bf16.msra.mxu3 %v321_v1  ;;  %s440_s0 = sld [smem:[#allocation2 + $0x81]]  ;;  %v147_v10 = vstv %s430_s14 }
  0x12   :  { %s442_s19 = sld [smem:[#allocation2 + $0x101]] }
  0x13   :  { %296 = vmatmul.msk.bf16.vlgmr.msra.gmra.mxu0 %vm71_vm0, %v55_v2  ;;  %298 = vmatmul.msk.bf16.vlgmr.msra.gmra.mxu1 %vm71_vm0, %v297_v3  ;;  %s444_s20 = sld [smem:[#allocation2 + $0x181]]  ;;  %v173_v11 = vstv %s432_s15 }
  0x14   :  { %300 = vmatmul.msk.bf16.vlgmr.msra.gmra.mxu2 %vm71_vm0, %v299_v4  ;;  %302 = vmatmul.msk.bf16.vlgmr.msra.gmra.mxu3 %vm71_vm0, %v301_v5  ;;  %s446_s21 = sld [smem:[#allocation2 + $0x2]]  ;;  %v196_v13 = vstv %s434_s16 }
  0x15   :  { %s448_s22 = sld [smem:[#allocation2 + $0x82]]  ;;  %v219_v14 = vstv %s436_s17 }
  0x16   :  { %s450_s23 = sld [smem:[#allocation2 + $0x102]]  ;;  %v150_v15 = vstv %s438_s18 }
  0x17   :  { %s455_s26 = sld [smem:[#allocation2 + $0x182]]  ;;  %v176_v16 = vstv %s440_s0 }
  0x18   :  { %s457_s27 = sld [smem:[#allocation2 + $0x103]]  ;;  %v199_v19 = vstv %s442_s19 }
  0x19   :  { %s459_s28 = sld [smem:[#allocation2 + $0x3]]  ;;  %v222_v20 = vstv %s444_s20 }
  0x1a   :  { %s461_s29 = sld [smem:[#allocation2 + $0x183]]  ;;  %v154_v30 = vstv %s446_s21 }
  0x1b   :  { %s465_s30 = sld [smem:[#allocation2 + $0x83]]  ;;  %v180_v31 = vstv %s448_s22 }
  0x1c   :  { %s473_s2 = sld [smem:[#allocation4 + $0x2]]  ;;  %v203_v32 = vstv %s450_s23 }
  0x1d   :  { %v226_v33 = vstv %s455_s26  ;;  %s479_s4 = sld [smem:[#allocation4]] }
  0x1e   :  { %v207_v39 = vstv %s457_s27  ;;  %s483_s7 = sld [smem:[#allocation4 + $0x3]] }
  0x1f   :  { %v158_v40 = vstv %s459_s28  ;;  %s487_s5 = sld [smem:[#allocation4 + $0x1]] }
  0x20   :  { %v230_v43 = vstv %s461_s29 }
  0x21   :  { %v184_v44 = vstv %s465_s30 }
  0x22   :  { %v211_v63 = vstv %s473_s2 }
  0x23   :  { %v162_v0 = vstv %s479_s4 }
  0x24   :  { %v234_v5 = vstv %s483_s7 }
  0x90   :  { %v84_v7 = vpop.f32.mrf.mxu0  ;;  %v103_v8 = vpop.f32.mrf.mxu1 }
  0x91   :  { %v85_v9 = vadd.f32 %v325_v6, %v84_v7  ;;  %v104_v12 = vadd.f32 %v325_v6, %v103_v8  ;;  %v326_v7 = vld [vmem:[%s507_s3] ss:$0 sm:$0xff] }
  0x93   :  { %v88_v17 = vmax.f32 %v85_v9, 0.0  ;;  %v107_v18 = vmax.f32 %v104_v12, 0.0 }
  0x95   :  { %v148_v21 = vmul.f32 %v147_v10, %v88_v17  ;;  %v174_v22 = vmul.f32 %v173_v11, %v88_v17  ;;  %v197_v23 = vmul.f32 %v196_v13, %v88_v17  ;;  %v220_v24 = vmul.f32 %v219_v14, %v88_v17 }
  0x96   :  { %v151_v25 = vmul.f32 %v150_v15, %v107_v18  ;;  %v177_v26 = vmul.f32 %v176_v16, %v107_v18  ;;  %v200_v27 = vmul.f32 %v199_v19, %v107_v18  ;;  %v223_v28 = vmul.f32 %v222_v20, %v107_v18 }
  0x97   :  { %v122_v29 = vpop.f32.mrf.mxu2  ;;  %v141_v34 = vpop.f32.mrf.mxu3 }
  0x98   :  { %v123_v35 = vadd.f32 %v325_v6, %v122_v29  ;;  %v142_v36 = vadd.f32 %v325_v6, %v141_v34  ;;  %v86_v37 = vpop.f32.mrf.mxu0  ;;  %v105_v38 = vpop.f32.mrf.mxu1  ;;  %v201_v41 = vadd.f32 %v200_v27, %v197_v23  ;;  %v152_v42 = vadd.f32 %v151_v25, %v148_v21 }
  0x99   :  { %v224_v47 = vadd.f32 %v223_v28, %v220_v24  ;;  %v178_v48 = vadd.f32 %v177_v26, %v174_v22  ;;  %v188_v6 = vstv %s487_s5 }
  0x9a   :  { %v126_v45 = vmax.f32 %v123_v35, 0.0  ;;  %v145_v46 = vmax.f32 %v142_v36, 0.0 }
  0x9c   :  { %v155_v49 = vmul.f32 %v154_v30, %v126_v45  ;;  %v181_v50 = vmul.f32 %v180_v31, %v126_v45  ;;  %v204_v51 = vmul.f32 %v203_v32, %v126_v45  ;;  %v227_v52 = vmul.f32 %v226_v33, %v126_v45 }
  0x9d   :  { %v208_v53 = vmul.f32 %v207_v39, %v145_v46  ;;  %v159_v54 = vmul.f32 %v158_v40, %v145_v46  ;;  %v231_v55 = vmul.f32 %v230_v43, %v145_v46  ;;  %v185_v56 = vmul.f32 %v184_v44, %v145_v46 }
  0x9e   :  { %v205_v57 = vadd.f32 %v204_v51, %v201_v41  ;;  %v156_v58 = vadd.f32 %v155_v49, %v152_v42  ;;  %v228_v59 = vadd.f32 %v227_v52, %v224_v47  ;;  %v182_v60 = vadd.f32 %v181_v50, %v178_v48 }
  0x9f   :  { %v124_v61 = vpop.f32.mrf.mxu2  ;;  %v143_v62 = vpop.f32.mrf.mxu3 }
  0xa0   :  { %v209_v1 = vadd.f32 %v208_v53, %v205_v57  ;;  %v160_v2 = vadd.f32 %v159_v54, %v156_v58  ;;  %v232_v3 = vadd.f32 %v231_v55, %v228_v59  ;;  %v186_v4 = vadd.f32 %v185_v56, %v182_v60 }
  0xa2   :  { %v212_v8 = vadd.f32 %v211_v63, %v209_v1  ;;  %v163_v9 = vadd.f32 %v162_v0, %v160_v2  ;;  %v235_v12 = vadd.f32 %v234_v5, %v232_v3  ;;  %v189_v13 = vadd.f32 %v188_v6, %v186_v4 }
  0xa4   :  { %v213_v10 = vmax.f32 %v212_v8, 0.0  ;;  %v164_v11 = vmax.f32 %v163_v9, 0.0  ;;  %v236_v18 = vmax.f32 %v235_v12, 0.0  ;;  %v190_v19 = vmax.f32 %v189_v13, 0.0 }
  0xa6   :  { %v214_v14 = vmul.f32 %v326_v7, %v213_v10  ;;  %v168_v15 = vmul.f32 %v326_v7, %v164_v11  ;;  %v237_v20 = vmul.f32 %v326_v7, %v236_v18  ;;  %v191_v21 = vmul.f32 %v326_v7, %v190_v19 }
  0xa8   :  { %v215_v16 = vsel %vm71_vm0, %v214_v14, 0.0  ;;  %v169_v17 = vsel %vm71_vm0, %v168_v15, 0.0  ;;  %v238_v22 = vsel %vm71_vm0, %v237_v20, 0.0  ;;  %v192_v23 = vsel %vm71_vm0, %v191_v21, 0.0 }
  0xa9   :  { %216 = vadd.xlane.f32.xlu1 %v215_v16  ;;  %170 = vadd.xlane.f32.xlu0 %v169_v17 }
  0xb1   :  { %239 = vadd.xlane.f32.xlu1 %v238_v22  ;;  %193 = vadd.xlane.f32.xlu0 %v192_v23 }
 0x11c   :  { %v171_v24 = vpop.xlane.xlu0 %170  ;;  %v217_v25 = vpop.xlane.xlu1 %216 }
 0x124   :  { %v194_v26 = vpop.xlane.xlu0 %193  ;;  %v240_v29 = vpop.xlane.xlu1 %239 }
 0x125   :  { %v241_v27 = vmax.f32 %v171_v24, %v194_v26 }
 0x127   :  { %v242_v28 = vmax.f32 %v241_v27, %v217_v25 }
 0x129   :  { %v243_v30 = vmax.f32 %v242_v28, %v240_v29 }
 0x12b   :  { %v244_v31 = vsub.f32 %v171_v24, %v243_v30  ;;  %v248_v32 = vsub.f32 %v194_v26, %v243_v30  ;;  %v254_v33 = vsub.f32 %v217_v25, %v243_v30  ;;  %v260_v34 = vsub.f32 %v240_v29, %v243_v30 }
 0x12d   :  { %v245_v35 = vmul.f32 1.442695, %v244_v31  ;;  %v249_v36 = vmul.f32 1.442695, %v248_v32  ;;  %v255_v37 = vmul.f32 1.442695, %v254_v33 }
 0x12e   :  { %v261_v38 = vmul.f32 1.442695, %v260_v34 }
 0x12f   :  { %327 = vpow2.f32 %v245_v35 }
 0x130   :  { %329 = vpow2.f32 %v249_v36 }
 0x131   :  { %331 = vpow2.f32 %v255_v37 }
 0x132   :  { %333 = vpow2.f32 %v261_v38 }
 0x135   :  { %v328_v39 = vpop.eup %327 }
 0x136   :  { %v330_v40 = vpop.eup %329  ;;  %v247_v46 = vmul.f32 %v328_v39, %v164_v11 }
 0x137   :  { %v251_v41 = vadd.f32 %v330_v40, %v328_v39  ;;  %v332_v42 = vpop.eup %331  ;;  %v252_v47 = vmul.f32 %v330_v40, %v190_v19 }
 0x138   :  { %v334_v44 = vpop.eup %333  ;;  %v258_v51 = vmul.f32 %v332_v42, %v213_v10 }
 0x139   :  { %v257_v43 = vadd.f32 %v332_v42, %v251_v41  ;;  %v253_v49 = vadd.f32 %v252_v47, %v247_v46  ;;  %v264_v57 = vmul.f32 %v334_v44, %v236_v18 }
 0x13b   :  { %v263_v45 = vadd.f32 %v334_v44, %v257_v43  ;;  %v259_v54 = vadd.f32 %v258_v51, %v253_v49 }
 0x13d   :  { %335 = vrcp.f32 %v263_v45  ;;  %v277_v53 = vand.u32 2147483648, %v263_v45  ;;  %v275_v56 = vand.u32 2147483647, %v263_v45  ;;  %vm271_vm2 = vweird.f32 %v263_v45 }
 0x13e   :  { %v265_v60 = vadd.f32 %v264_v57, %v259_v54 }
 0x13f   :  { %v278_v59 = vor.u32 1.1754944e-38, %v277_v53  ;;  %vm276_vm4 = vcmp.eq.f32.partialorder %v275_v56, 8.507059e+37 }
 0x143   :  { %v336_v48 = vpop.eup %335 }
 0x144   :  { %v267_v50 = vmul.f32 %v336_v48, %v263_v45  ;;  %vm272_vm1 = vweird.f32 %v336_v48 }
 0x145   :  { %vm273_vm3 = vmor %vm271_vm2, %vm272_vm1 }
 0x146   :  { %v268_v52 = vsub.f32 1.0, %v267_v50 }
 0x148   :  { %v269_v55 = vmul.f32 %v336_v48, %v268_v52 }
 0x14a   :  { %v270_v58 = vadd.f32 %v336_v48, %v269_v55 }
 0x14c   :  { %v274_v61 = vsel %vm273_vm3, %v336_v48, %v270_v58 }
 0x14d   :  { %v279_v62 = vsel %vm276_vm4, %v278_v59, %v274_v61 }
 0x14e   :  { %v280_v63 = vmul.f32 %v279_v62, %v265_v60 }
 0x150   :  { %281 = vst.msk [vmem:[%s510_s6] sm:$0xff] %vm71_vm0, %v280_v63 }
 0x151   :  { %286 = vsyncpa [#allocation3], 1 }
 0x152   :  { %287 = vsyncpa [#allocation5], 1 }

</bundles_post_ra>
